<compile_context>
chip_gen: v7x
topology: tpu7x:2x2x1
jax: 0.10.0
libtpu: 0.0.40
codegen_flags: <defaults>
</compile_context>

<pallas_src>
import math
from functools import partial

import jax
import jax.numpy as jnp
from jax.experimental import pallas as pl
from jax.experimental.pallas import tpu as pltpu

_DIMS = (6, 256, 128, 64, 16, 1)
_IN_PAD = 8  # input feature dim zero-padded 6 -> 8 (sublane-friendly contraction dim)


def _round_up(n, m):
    return ((n + m - 1) // m) * m


def _mlp_kernel(x_ref,
                w1_ref, b1_ref, w2_ref, b2_ref, w3_ref, b3_ref,
                w4_ref, b4_ref, w5_ref, b5_ref, o_ref):
    """One (TILE_B, 8) batch-major tile -> (1, TILE_B) sigmoid outputs, fully in VMEM."""
    # Layer 1: contract the (zero-padded) size-8 feature dim straight out of the
    # batch-major block (A @ B^T form), producing the feature-major (256, TILE_B)
    # orientation used by the rest of the network.  bf16 operands, f32 accumulation.
    h = jax.lax.dot_general(
        w1_ref[...], x_ref[...],
        dimension_numbers=(((1,), (1,)), ((), ())),
        preferred_element_type=jnp.float32) + b1_ref[...]
    h = jnp.maximum(h, 0.0).astype(jnp.bfloat16)                              # (256, TB)

    # Layers 2..4: MXU matmuls (bf16 operands, f32 accumulation) + bias + ReLU.
    h = jnp.dot(w2_ref[...], h, preferred_element_type=jnp.float32) + b2_ref[...]
    h = jnp.maximum(h, 0.0).astype(jnp.bfloat16)                              # (128, TB)
    h = jnp.dot(w3_ref[...], h, preferred_element_type=jnp.float32) + b3_ref[...]
    h = jnp.maximum(h, 0.0).astype(jnp.bfloat16)                              # (64, TB)
    h = jnp.dot(w4_ref[...], h, preferred_element_type=jnp.float32) + b4_ref[...]
    h = jnp.maximum(h, 0.0)                                                   # (16, TB) f32

    # Layer 5 (16 -> 1) on VPU/XLU: broadcast-mul + sublane reduce, all f32.
    logits = jnp.sum(w5_ref[...] * h, axis=0, keepdims=True) + b5_ref[...]    # (1, TB)
    o_ref[...] = jax.nn.sigmoid(logits).astype(o_ref.dtype)


@partial(jax.jit, static_argnames=("tile_b",))
def action_conditioned_ff(x, params, tile_b=4096):
    """x: (B, 6) float32. params: see init_params. Returns (B, 1) float32."""
    B = x.shape[0]

    # Tile-size policy (all static Python): round to a lane multiple, never exceed the
    # padded batch, then pick a balanced step count that keeps >= 2 grid steps whenever
    # the batch allows (so dimension_semantics=("parallel",) feeds both v7x TensorCores).
    b_req = _round_up(B, 128)
    tile_b = _round_up(max(int(tile_b), 128), 128)
    tile_b = min(tile_b, b_req)
    n_steps = -(-b_req // tile_b)
    if n_steps == 1 and b_req >= 256:
        n_steps = 2
    tile_b = _round_up(-(-b_req // n_steps), 128)
    b_pad = tile_b * n_steps

    # Layout plumbing is a single fused cast+pad (no strided HBM->HBM transpose):
    # stream x as bf16, pad features 6 -> 8 with zeros (numerically neutral) and pad
    # the batch up to a tile multiple.
    x_in = jnp.pad(x.astype(jnp.bfloat16),
                   ((0, b_pad - B), (0, _IN_PAD - _DIMS[0])))                 # (b_pad, 8)

    args = (x_in,
            params["w1"], params["b1"], params["w2"], params["b2"],
            params["w3"], params["b3"], params["w4"], params["b4"],
            params["w5"], params["b5"])

    def _resident(arr):
        # Full-array block, constant block index -> DMA'd once, kept in VMEM.
        return pl.BlockSpec(arr.shape, lambda i: (0, 0))

    in_specs = [pl.BlockSpec((tile_b, _IN_PAD), lambda i: (i, 0))] + \
               [_resident(a) for a in args[1:]]

    # VMEM budget derived from the tile: double-buffered, layout-padded x/out blocks
    # + ~4 KiB/row of live activation slabs + resident weights + fixed headroom,
    # clamped to <= 48 MiB so it stays safe on v7x's 64 MiB per TensorCore.
    in_block_bytes = tile_b * 128 * 2          # (tile_b, 8) bf16, lane-padded to 128
    out_block_bytes = 8 * tile_b * 4           # (1, tile_b) f32, sublane-padded to 8
    vmem_limit = (4 << 20) + 2 * (in_block_bytes + out_block_bytes) + 4 * 1024 * tile_b
    vmem_limit = int(max(24 << 20, min(vmem_limit, 48 << 20)))

    out = pl.pallas_call(
        _mlp_kernel,
        out_shape=jax.ShapeDtypeStruct((1, b_pad), jnp.float32),
        grid=(b_pad // tile_b,),
        in_specs=in_specs,
        out_specs=pl.BlockSpec((1, tile_b), lambda i: (0, i)),
        compiler_params=pltpu.CompilerParams(
            dimension_semantics=("parallel",),   # megacore split on v7x; harmless on v5e/v6e
            vmem_limit_bytes=vmem_limit,
        ),
    )(*args)
    return out.reshape(b_pad, 1)[:B]


def init_params(key):
    """nn.Linear default init (uniform +-1/sqrt(fan_in)).

    Weights kept in PyTorch (out, in) layout, bf16 for the 4 MXU layers (w1 is
    zero-padded (256, 6) -> (256, 8) to match the padded input feature dim); the
    final (16 -> 1) weight is a (16, 1) f32 column (VPU layer); biases are (out, 1) f32.
    """
    params = {}
    for i in range(5):
        fan_in, fan_out = _DIMS[i], _DIMS[i + 1]
        key, kw, kb = jax.random.split(key, 3)
        bound = 1.0 / math.sqrt(fan_in)
        w = jax.random.uniform(kw, (fan_out, fan_in), jnp.float32, minval=-bound, maxval=bound)
        b = jax.random.uniform(kb, (fan_out, 1), jnp.float32, minval=-bound, maxval=bound)
        if i == 0:
            w = jnp.pad(w, ((0, 0), (0, _IN_PAD - fan_in)))
        params[f"w{i + 1}"] = w.astype(jnp.bfloat16) if i < 4 else w.T  # last: (16, 1) f32
        params[f"b{i + 1}"] = b
    return params


def _reference(x, params):
    """Pure-JAX forward mirroring the kernel's precision choices (bf16 MXU layers)."""
    h = jnp.pad(x, ((0, 0), (0, _IN_PAD - _DIMS[0]))).astype(jnp.bfloat16)
    for i in (1, 2, 3, 4):
        w = params[f"w{i}"]                       # (out, in)
        b = params[f"b{i}"][:, 0]                 # (out,)
        h = jnp.dot(h, w.T, preferred_element_type=jnp.float32) + b
        h = jnp.maximum(h, 0.0)
        if i < 4:
            h = h.astype(jnp.bfloat16)
    logits = h @ params["w5"] + params["b5"][0, 0]  # (B, 1) f32
    return jax.nn.sigmoid(logits)


# TODO(synk): `evaluate()` in the PyTorch module is a host-side DataLoader loop
# (loss averaging), not part of the forward pass, so it is intentionally not a kernel.

if __name__ == "__main__":
    key = jax.random.PRNGKey(0)
    kp, kx = jax.random.split(key)
    params = init_params(kp)

    batch = 8
    x = jax.random.normal(kx, (batch, _DIMS[0]), jnp.float32)

    out = jax.block_until_ready(action_conditioned_ff(x, params))
    ref = _reference(x, params)

    assert out.shape == (batch, 1)
    assert bool(jnp.all(jnp.isfinite(out)))
    assert jnp.allclose(out, ref, atol=2e-3, rtol=2e-3), float(jnp.max(jnp.abs(out - ref)))
    print("KERNEL_OK")
</pallas_src>

<mosaic_0001>
module attributes {stable_mosaic.version = 11 : i64} {
  func.func @_mlp_kernel(%arg0: i32, %arg1: memref<128x8xbf16, #tpu.memory_space<vmem>>, %arg2: memref<256x8xbf16, #tpu.memory_space<vmem>>, %arg3: memref<256x1xf32, #tpu.memory_space<vmem>>, %arg4: memref<128x256xbf16, #tpu.memory_space<vmem>>, %arg5: memref<128x1xf32, #tpu.memory_space<vmem>>, %arg6: memref<64x128xbf16, #tpu.memory_space<vmem>>, %arg7: memref<64x1xf32, #tpu.memory_space<vmem>>, %arg8: memref<16x64xbf16, #tpu.memory_space<vmem>>, %arg9: memref<16x1xf32, #tpu.memory_space<vmem>>, %arg10: memref<16x1xf32, #tpu.memory_space<vmem>>, %arg11: memref<1x1xf32, #tpu.memory_space<vmem>>, %arg12: memref<1x128xf32, #tpu.memory_space<vmem>>) attributes {dimension_semantics = [#tpu.dimension_semantics<parallel>], iteration_bounds = array<i64: 1>, scalar_prefetch = 0 : i64, scratch_operands = 0 : i64, tpu.core_type = #tpu.core_type<tc>, window_params = [{transform_indices = @transform_0, window_bounds = array<i64: 128, 8>}, {pipeline_mode = #tpu.pipeline_mode<synchronous>, transform_indices = @transform_1, window_bounds = array<i64: 256, 8>}, {pipeline_mode = #tpu.pipeline_mode<synchronous>, transform_indices = @transform_2, window_bounds = array<i64: 256, 1>}, {pipeline_mode = #tpu.pipeline_mode<synchronous>, transform_indices = @transform_3, window_bounds = array<i64: 128, 256>}, {pipeline_mode = #tpu.pipeline_mode<synchronous>, transform_indices = @transform_4, window_bounds = array<i64: 128, 1>}, {pipeline_mode = #tpu.pipeline_mode<synchronous>, transform_indices = @transform_5, window_bounds = array<i64: 64, 128>}, {pipeline_mode = #tpu.pipeline_mode<synchronous>, transform_indices = @transform_6, window_bounds = array<i64: 64, 1>}, {pipeline_mode = #tpu.pipeline_mode<synchronous>, transform_indices = @transform_7, window_bounds = array<i64: 16, 64>}, {pipeline_mode = #tpu.pipeline_mode<synchronous>, transform_indices = @transform_8, window_bounds = array<i64: 16, 1>}, {pipeline_mode = #tpu.pipeline_mode<synchronous>, transform_indices = @transform_9, window_bounds = array<i64: 16, 1>}, {pipeline_mode = #tpu.pipeline_mode<synchronous>, transform_indices = @transform_10, window_bounds = array<i64: 1, 1>}, {transform_indices = @transform_11, window_bounds = array<i64: 1, 128>}]} {
    %c0 = arith.constant 0 : index
    %c0_0 = arith.constant 0 : index
    %0 = vector.load %arg2[%c0, %c0_0] : memref<256x8xbf16, #tpu.memory_space<vmem>>, vector<256x8xbf16>
    %c0_1 = arith.constant 0 : index
    %c0_2 = arith.constant 0 : index
    %1 = vector.load %arg1[%c0_1, %c0_2] : memref<128x8xbf16, #tpu.memory_space<vmem>>, vector<128x8xbf16>
    %cst = arith.constant dense<0.000000e+00> : vector<256x128xf32>
    %2 = tpu.matmul %0, %1, %cst {dimension_numbers = #tpu.dot_dimension_numbers<[1], [1], [0], [0], [0, 0, 1, 0], [], []>} : vector<256x8xbf16>, vector<128x8xbf16>, vector<256x128xf32> -> vector<256x128xf32>
    %c0_3 = arith.constant 0 : index
    %c0_4 = arith.constant 0 : index
    %3 = vector.load %arg3[%c0_3, %c0_4] : memref<256x1xf32, #tpu.memory_space<vmem>>, vector<256x1xf32>
    %4 = vector.broadcast %3 : vector<256x1xf32> to vector<256x128xf32>
    %5 = arith.addf %2, %4 : vector<256x128xf32>
    %cst_5 = arith.constant 0.000000e+00 : f32
    %6 = vector.broadcast %cst_5 : f32 to vector<256x128xf32>
    %7 = arith.maximumf %5, %6 : vector<256x128xf32>
    %8 = arith.truncf %7 : vector<256x128xf32> to vector<256x128xbf16>
    %c0_6 = arith.constant 0 : index
    %c0_7 = arith.constant 0 : index
    %9 = vector.load %arg4[%c0_6, %c0_7] : memref<128x256xbf16, #tpu.memory_space<vmem>>, vector<128x256xbf16>
    %cst_8 = arith.constant dense<0.000000e+00> : vector<128x128xf32>
    %10 = tpu.matmul %9, %8, %cst_8 {dimension_numbers = #tpu.dot_dimension_numbers<[1], [0], [0], [1], [0, 0, 1, 1], [], []>} : vector<128x256xbf16>, vector<256x128xbf16>, vector<128x128xf32> -> vector<128x128xf32>
    %c0_9 = arith.constant 0 : index
    %c0_10 = arith.constant 0 : index
    %11 = vector.load %arg5[%c0_9, %c0_10] : memref<128x1xf32, #tpu.memory_space<vmem>>, vector<128x1xf32>
    %12 = vector.broadcast %11 : vector<128x1xf32> to vector<128x128xf32>
    %13 = arith.addf %10, %12 : vector<128x128xf32>
    %cst_11 = arith.constant 0.000000e+00 : f32
    %14 = vector.broadcast %cst_11 : f32 to vector<128x128xf32>
    %15 = arith.maximumf %13, %14 : vector<128x128xf32>
    %16 = arith.truncf %15 : vector<128x128xf32> to vector<128x128xbf16>
    %c0_12 = arith.constant 0 : index
    %c0_13 = arith.constant 0 : index
    %17 = vector.load %arg6[%c0_12, %c0_13] : memref<64x128xbf16, #tpu.memory_space<vmem>>, vector<64x128xbf16>
    %cst_14 = arith.constant dense<0.000000e+00> : vector<64x128xf32>
    %18 = tpu.matmul %17, %16, %cst_14 {dimension_numbers = #tpu.dot_dimension_numbers<[1], [0], [0], [1], [0, 0, 1, 1], [], []>} : vector<64x128xbf16>, vector<128x128xbf16>, vector<64x128xf32> -> vector<64x128xf32>
    %c0_15 = arith.constant 0 : index
    %c0_16 = arith.constant 0 : index
    %19 = vector.load %arg7[%c0_15, %c0_16] : memref<64x1xf32, #tpu.memory_space<vmem>>, vector<64x1xf32>
    %20 = vector.broadcast %19 : vector<64x1xf32> to vector<64x128xf32>
    %21 = arith.addf %18, %20 : vector<64x128xf32>
    %cst_17 = arith.constant 0.000000e+00 : f32
    %22 = vector.broadcast %cst_17 : f32 to vector<64x128xf32>
    %23 = arith.maximumf %21, %22 : vector<64x128xf32>
    %24 = arith.truncf %23 : vector<64x128xf32> to vector<64x128xbf16>
    %c0_18 = arith.constant 0 : index
    %c0_19 = arith.constant 0 : index
    %25 = vector.load %arg8[%c0_18, %c0_19] : memref<16x64xbf16, #tpu.memory_space<vmem>>, vector<16x64xbf16>
    %cst_20 = arith.constant dense<0.000000e+00> : vector<16x128xf32>
    %26 = tpu.matmul %25, %24, %cst_20 {dimension_numbers = #tpu.dot_dimension_numbers<[1], [0], [0], [1], [0, 0, 1, 1], [], []>} : vector<16x64xbf16>, vector<64x128xbf16>, vector<16x128xf32> -> vector<16x128xf32>
    %c0_21 = arith.constant 0 : index
    %c0_22 = arith.constant 0 : index
    %27 = vector.load %arg9[%c0_21, %c0_22] : memref<16x1xf32, #tpu.memory_space<vmem>>, vector<16x1xf32>
    %28 = vector.broadcast %27 : vector<16x1xf32> to vector<16x128xf32>
    %29 = arith.addf %26, %28 : vector<16x128xf32>
    %cst_23 = arith.constant 0.000000e+00 : f32
    %30 = vector.broadcast %cst_23 : f32 to vector<16x128xf32>
    %31 = arith.maximumf %29, %30 : vector<16x128xf32>
    %c0_24 = arith.constant 0 : index
    %c0_25 = arith.constant 0 : index
    %32 = vector.load %arg10[%c0_24, %c0_25] : memref<16x1xf32, #tpu.memory_space<vmem>>, vector<16x1xf32>
    %33 = vector.broadcast %32 : vector<16x1xf32> to vector<16x128xf32>
    %34 = arith.mulf %33, %31 : vector<16x128xf32>
    %cst_26 = arith.constant dense<0.000000e+00> : vector<128xf32>
    %35 = vector.multi_reduction <add>, %34, %cst_26 [0] : vector<16x128xf32> to vector<128xf32>
    %36 = vector.shape_cast %35 : vector<128xf32> to vector<1x128xf32>
    %c0_27 = arith.constant 0 : index
    %c0_28 = arith.constant 0 : index
    %37 = vector.load %arg11[%c0_27, %c0_28] : memref<1x1xf32, #tpu.memory_space<vmem>>, vector<1x1xf32>
    %38 = vector.broadcast %37 : vector<1x1xf32> to vector<1x128xf32>
    %39 = arith.addf %36, %38 : vector<1x128xf32>
    %40 = arith.negf %39 : vector<1x128xf32>
    %41 = math.exp %40 : vector<1x128xf32>
    %cst_29 = arith.constant 1.000000e+00 : f32
    %42 = vector.broadcast %cst_29 : f32 to vector<1x128xf32>
    %43 = arith.addf %42, %41 : vector<1x128xf32>
    %44 = arith.divf %42, %43 : vector<1x128xf32>
    %c0_30 = arith.constant 0 : index
    %c0_31 = arith.constant 0 : index
    %45 = vector.load %arg12[%c0_30, %c0_31] : memref<1x128xf32, #tpu.memory_space<vmem>>, vector<1x128xf32>
    tpu.vector_store %arg12[%c0_30, %c0_31], %44 {strides = array<i32>} : memref<1x128xf32, #tpu.memory_space<vmem>>, vector<1x128xf32>,
    return
  }
  func.func @transform_0(%arg0: i32) -> (i32, i32) {
    %c0_i32 = arith.constant 0 : i32
    %c0_i32_0 = arith.constant 0 : i32
    return %arg0, %c0_i32 : i32, i32
  }
  func.func @transform_1(%arg0: i32) -> (i32, i32) {
    %c0_i32 = arith.constant 0 : i32
    %c0_i32_0 = arith.constant 0 : i32
    %c0_i32_1 = arith.constant 0 : i32
    return %c0_i32, %c0_i32_0 : i32, i32
  }
  func.func @transform_2(%arg0: i32) -> (i32, i32) {
    %c0_i32 = arith.constant 0 : i32
    %c0_i32_0 = arith.constant 0 : i32
    %c0_i32_1 = arith.constant 0 : i32
    return %c0_i32, %c0_i32_0 : i32, i32
  }
  func.func @transform_3(%arg0: i32) -> (i32, i32) {
    %c0_i32 = arith.constant 0 : i32
    %c0_i32_0 = arith.constant 0 : i32
    %c0_i32_1 = arith.constant 0 : i32
    return %c0_i32, %c0_i32_0 : i32, i32
  }
  func.func @transform_4(%arg0: i32) -> (i32, i32) {
    %c0_i32 = arith.constant 0 : i32
    %c0_i32_0 = arith.constant 0 : i32
    %c0_i32_1 = arith.constant 0 : i32
    return %c0_i32, %c0_i32_0 : i32, i32
  }
  func.func @transform_5(%arg0: i32) -> (i32, i32) {
    %c0_i32 = arith.constant 0 : i32
    %c0_i32_0 = arith.constant 0 : i32
    %c0_i32_1 = arith.constant 0 : i32
    return %c0_i32, %c0_i32_0 : i32, i32
  }
  func.func @transform_6(%arg0: i32) -> (i32, i32) {
    %c0_i32 = arith.constant 0 : i32
    %c0_i32_0 = arith.constant 0 : i32
    %c0_i32_1 = arith.constant 0 : i32
    return %c0_i32, %c0_i32_0 : i32, i32
  }
  func.func @transform_7(%arg0: i32) -> (i32, i32) {
    %c0_i32 = arith.constant 0 : i32
    %c0_i32_0 = arith.constant 0 : i32
    %c0_i32_1 = arith.constant 0 : i32
    return %c0_i32, %c0_i32_0 : i32, i32
  }
  func.func @transform_8(%arg0: i32) -> (i32, i32) {
    %c0_i32 = arith.constant 0 : i32
    %c0_i32_0 = arith.constant 0 : i32
    %c0_i32_1 = arith.constant 0 : i32
    return %c0_i32, %c0_i32_0 : i32, i32
  }
  func.func @transform_9(%arg0: i32) -> (i32, i32) {
    %c0_i32 = arith.constant 0 : i32
    %c0_i32_0 = arith.constant 0 : i32
    %c0_i32_1 = arith.constant 0 : i32
    return %c0_i32, %c0_i32_0 : i32, i32
  }
  func.func @transform_10(%arg0: i32) -> (i32, i32) {
    %c0_i32 = arith.constant 0 : i32
    %c0_i32_0 = arith.constant 0 : i32
    %c0_i32_1 = arith.constant 0 : i32
    return %c0_i32, %c0_i32_0 : i32, i32
  }
  func.func @transform_11(%arg0: i32) -> (i32, i32) {
    %c0_i32 = arith.constant 0 : i32
    %c0_i32_0 = arith.constant 0 : i32
    return %c0_i32, %arg0 : i32, i32
  }
}

</mosaic_0001>

<bundles_post_ra>
// kernel: action_conditioned_ff.1
= control target key start
LH: loop header
LB: loop body
LE: loop exit
PB: predicated region body
PF: predicated region fallthrough
CT: control target
= control target key end

     0   :  { %vm401_vm0 = vcmask 64512   ;;  %v1584_v1 = vmov 0   ;;  %vm1586_vm1 = vmmov 0   ;;  %vm1172_vm2 = vcmask 523264   ;;  %s2072_s0 = inlined_call_operand.vmem [shape: bf16[128,8], index: 0, kind: input, shape index: {}]   ;;  %s2073_s10 = inlined_call_operand.<no memory space> [shape: f32[1,1], index: 10, kind: input, shape index: {}]   ;;  %s2074_s2 = inlined_call_operand.vmem [shape: f32[256,1], index: 2, kind: input, shape index: {}]   ;;  %s2075_s1 = inlined_call_operand.vmem [shape: bf16[256,8], index: 1, kind: input, shape index: {}]   ;;  %s2076_s4 = inlined_call_operand.vmem [shape: f32[128,1], index: 4, kind: input, shape index: {}]   ;;  %s2077_s6 = inlined_call_operand.vmem [shape: f32[64,1], index: 6, kind: input, shape index: {}]   ;;  %s2078_s8 = inlined_call_operand.vmem [shape: f32[16,1], index: 8, kind: input, shape index: {}]   ;;  %s2079_s9 = inlined_call_operand.vmem [shape: f32[16,1], index: 9, kind: input, shape index: {}]   ;;  %s2080_s3 = inlined_call_operand.vmem [shape: bf16[128,256], index: 3, kind: input, shape index: {}]   ;;  %s2081_s5 = inlined_call_operand.vmem [shape: bf16[64,128], index: 5, kind: input, shape index: {}]   ;;  %s2082_s7 = inlined_call_operand.vmem [shape: bf16[16,64], index: 7, kind: input, shape index: {}]   ;;  %s2083_s11 = inlined_call_operand.vmem [shape: f32[1,128], index: 11, kind: output, shape index: {}]  }
   0x1   :  { %v1527_v0 = vld [vmem:[%s2072_s0] sm:$0xff]   ;;  %1525 = vset.pattern.permute.xlu0 %v1584_v1  ;;  %1526 = vset.pattern.permute.xlu1 %v1584_v1  ;;  %v16_v2 = vstv %s2073_s10  ;;  %v1528_v3 = vld [vmem:[%s2072_s0 + $0x8] sm:$0xff]   ;;  %v1529_v10 = vld [vmem:[%s2072_s0 + $0x10] sm:$0xff]  }
   0x2   :  { %17 = vst [vmem:[#allocation2] sm:$0x1] %v16_v2  ;;  %1514 = vmatprep.subr.msk.bf16.mxu0 %vm401_vm0, %v1527_v0  ;;  %v451_v4 = vsel %vm401_vm0, %v1527_v0, 0  ;;  %v105_v5 = vld [vmem:[%s2074_s2 + $0x80] sm:$0xff]  ;;  %v106_v7 = vld [vmem:[%s2074_s2 + $0x88] sm:$0xff]  ;;  %v454_v9 = vsel %vm401_vm0, %v1528_v3, 0 }
   0x3   :  { %1431 = vmatpush3.bf16.xpose.msra.mxu0 %v451_v4  ;;  %203 = vperm.xlu0 %1525, %v105_v5   ;;  %v89_v6 = vld [vmem:[%s2074_s2] sm:$0xff]  ;;  %v90_v8 = vld [vmem:[%s2074_s2 + $0x8] sm:$0xff]  ;;  %v107_v11 = vld [vmem:[%s2074_s2 + $0x90] sm:$0xff]  ;;  %v457_v16 = vsel %vm401_vm0, %v1529_v10, 0 }
   0x4   :  { %1515 = vmatprep.subr.msk.bf16.mxu0 %vm401_vm0, %v1528_v3  ;;  %123 = vperm.xlu1 %1526, %v89_v6   ;;  %v108_v12 = vld [vmem:[%s2074_s2 + $0x98] sm:$0xff]  ;;  %v1535_v13 = vld [vmem:[%s2075_s1] sm:$0xff]   ;;  %v91_v14 = vld [vmem:[%s2074_s2 + $0x10] sm:$0xff] }
   0x5   :  { %v92_v15 = vld [vmem:[%s2074_s2 + $0x18] sm:$0xff]  ;;  %1446 = vmatprep.mubr.msk.bf16.mxu0 %vm401_vm0, %v1535_v13  ;;  %v109_v18 = vld [vmem:[%s2074_s2 + $0xa0] sm:$0xff]  ;;  %v110_v19 = vld [vmem:[%s2074_s2 + $0xa8] sm:$0xff] }
   0x6   :  { %v1530_v17 = vld [vmem:[%s2072_s0 + $0x18] sm:$0xff]   ;;  %v93_v20 = vld [vmem:[%s2074_s2 + $0x20] sm:$0xff]  ;;  %v94_v21 = vld [vmem:[%s2074_s2 + $0x28] sm:$0xff] }
   0x7   :  { %208 = vperm.xlu0 %1525, %v106_v7   ;;  %v460_v22 = vsel %vm401_vm0, %v1530_v17, 0  ;;  %v1531_v23 = vld [vmem:[%s2072_s0 + $0x20] sm:$0xff]   ;;  %v111_v24 = vld [vmem:[%s2074_s2 + $0xb0] sm:$0xff]  ;;  %v112_v25 = vld [vmem:[%s2074_s2 + $0xb8] sm:$0xff] }
   0x8   :  { %128 = vperm.xlu1 %1526, %v90_v8   ;;  %v95_v26 = vld [vmem:[%s2074_s2 + $0x30] sm:$0xff]  ;;  %v96_v27 = vld [vmem:[%s2074_s2 + $0x38] sm:$0xff]  ;;  %v463_v28 = vsel %vm401_vm0, %v1531_v23, 0  ;;  %v1532_v29 = vld [vmem:[%s2072_s0 + $0x28] sm:$0xff]  }
   0x9   :  { %v113_v30 = vld [vmem:[%s2074_s2 + $0xc0] sm:$0xff]  ;;  %v114_v31 = vld [vmem:[%s2074_s2 + $0xc8] sm:$0xff]  ;;  %v466_v34 = vsel %vm401_vm0, %v1532_v29, 0  ;;  %v1533_v35 = vld [vmem:[%s2072_s0 + $0x30] sm:$0xff]  }
   0xa   :  { %v97_v32 = vld [vmem:[%s2074_s2 + $0x40] sm:$0xff]  ;;  %v98_v33 = vld [vmem:[%s2074_s2 + $0x48] sm:$0xff]  ;;  %v115_v36 = vld [vmem:[%s2074_s2 + $0xd0] sm:$0xff]  ;;  %v469_v40 = vsel %vm401_vm0, %v1533_v35, 0 }
   0xb   :  { %1433 = vmatpush3.bf16.xpose.msra.mxu0 %v454_v9  ;;  %213 = vperm.xlu0 %1525, %v107_v11   ;;  %v116_v37 = vld [vmem:[%s2074_s2 + $0xd8] sm:$0xff]  ;;  %v99_v38 = vld [vmem:[%s2074_s2 + $0x50] sm:$0xff]  ;;  %v117_v42 = vld [vmem:[%s2074_s2 + $0xe0] sm:$0xff] }
   0xc   :  { %1516 = vmatprep.subr.msk.bf16.mxu0 %vm401_vm0, %v1529_v10  ;;  %218 = vperm.xlu1 %1526, %v108_v12   ;;  %v100_v39 = vld [vmem:[%s2074_s2 + $0x58] sm:$0xff]  ;;  %v118_v43 = vld [vmem:[%s2074_s2 + $0xe8] sm:$0xff]  ;;  %v101_v44 = vld [vmem:[%s2074_s2 + $0x60] sm:$0xff] }
   0xd   :  { %v1534_v41 = vld [vmem:[%s2072_s0 + $0x38] sm:$0xff]   ;;  %v102_v45 = vld [vmem:[%s2074_s2 + $0x68] sm:$0xff]  ;;  %v119_v47 = vld [vmem:[%s2074_s2 + $0xf0] sm:$0xff] }
   0xe   :  { %v472_v46 = vsel %vm401_vm0, %v1534_v41, 0  ;;  %v120_v48 = vld [vmem:[%s2074_s2 + $0xf8] sm:$0xff]  ;;  %v1536_v49 = vld [vmem:[%s2075_s1 + $0x8] sm:$0xff]   ;;  %v103_v50 = vld [vmem:[%s2074_s2 + $0x70] sm:$0xff] }
   0xf   :  { %133 = vperm.xlu0 %1525, %v91_v14   ;;  %v1537_v51 = vld [vmem:[%s2075_s1 + $0x10] sm:$0xff]   ;;  %v104_v52 = vld [vmem:[%s2074_s2 + $0x78] sm:$0xff]  ;;  %v699_v53 = vld [vmem:[%s2076_s4] sm:$0xff] }
  0x10   :  { %138 = vperm.xlu1 %1526, %v92_v15   ;;  %v700_v54 = vld [vmem:[%s2076_s4 + $0x8] sm:$0xff]  ;;  %v1538_v55 = vld [vmem:[%s2075_s1 + $0x18] sm:$0xff]   ;;  %v701_v56 = vld [vmem:[%s2076_s4 + $0x10] sm:$0xff] }
  0x11   :  { %v1539_v57 = vld [vmem:[%s2075_s1 + $0x20] sm:$0xff]   ;;  %v702_v58 = vld [vmem:[%s2076_s4 + $0x18] sm:$0xff]  ;;  %v704_v60 = vld [vmem:[%s2076_s4 + $0x28] sm:$0xff] }
  0x12   :  { %v703_v59 = vld [vmem:[%s2076_s4 + $0x20] sm:$0xff]  ;;  %v1540_v61 = vld [vmem:[%s2075_s1 + $0x28] sm:$0xff]   ;;  %v705_v62 = vld [vmem:[%s2076_s4 + $0x30] sm:$0xff] }
  0x13   :  { %1435 = vmatpush3.bf16.xpose.msra.mxu0 %v457_v16  ;;  %223 = vperm.xlu0 %1525, %v109_v18   ;;  %v1541_v63 = vld [vmem:[%s2075_s1 + $0x30] sm:$0xff]   ;;  %v706_v0 = vld [vmem:[%s2076_s4 + $0x38] sm:$0xff]  ;;  %v707_v1 = vld [vmem:[%s2076_s4 + $0x40] sm:$0xff] }
  0x14   :  { %1517 = vmatprep.subr.msk.bf16.mxu0 %vm401_vm0, %v1530_v17  ;;  %228 = vperm.xlu1 %1526, %v110_v19   ;;  %v708_v2 = vld [vmem:[%s2076_s4 + $0x48] sm:$0xff]  ;;  %v1542_v3 = vld [vmem:[%s2075_s1 + $0x38] sm:$0xff]   ;;  %v709_v4 = vld [vmem:[%s2076_s4 + $0x50] sm:$0xff] }
  0x15   :  { %v1543_v5 = vld [vmem:[%s2075_s1 + $0x40] sm:$0xff]   ;;  %v710_v6 = vld [vmem:[%s2076_s4 + $0x58] sm:$0xff]  ;;  %v712_v8 = vld [vmem:[%s2076_s4 + $0x68] sm:$0xff] }
  0x16   :  { %v711_v7 = vld [vmem:[%s2076_s4 + $0x60] sm:$0xff]  ;;  %v1544_v9 = vld [vmem:[%s2075_s1 + $0x48] sm:$0xff]   ;;  %v713_v10 = vld [vmem:[%s2076_s4 + $0x70] sm:$0xff] }
  0x17   :  { %143 = vperm.xlu0 %1525, %v93_v20   ;;  %v1545_v11 = vld [vmem:[%s2075_s1 + $0x50] sm:$0xff]   ;;  %v714_v12 = vld [vmem:[%s2076_s4 + $0x78] sm:$0xff]  ;;  %v1004_v13 = vld [vmem:[%s2077_s6] sm:$0xff] }
  0x18   :  { %148 = vperm.xlu1 %1526, %v94_v21   ;;  %v1005_v14 = vld [vmem:[%s2077_s6 + $0x8] sm:$0xff]  ;;  %v1546_v15 = vld [vmem:[%s2075_s1 + $0x58] sm:$0xff]   ;;  %v1006_v16 = vld [vmem:[%s2077_s6 + $0x10] sm:$0xff] }
  0x19   :  { %v1547_v17 = vld [vmem:[%s2075_s1 + $0x60] sm:$0xff]   ;;  %v1007_v18 = vld [vmem:[%s2077_s6 + $0x18] sm:$0xff]  ;;  %v1009_v20 = vld [vmem:[%s2077_s6 + $0x28] sm:$0xff] }
  0x1a   :  { %v1008_v19 = vld [vmem:[%s2077_s6 + $0x20] sm:$0xff]  ;;  %v1548_v21 = vld [vmem:[%s2075_s1 + $0x68] sm:$0xff]  }
  0x1b   :  { %1437 = vmatpush3.bf16.xpose.msra.mxu0 %v460_v22  ;;  %233 = vperm.xlu0 %1525, %v111_v24   ;;  %v1010_v22 = vld [vmem:[%s2077_s6 + $0x30] sm:$0xff]  ;;  %v1011_v24 = vld [vmem:[%s2077_s6 + $0x38] sm:$0xff] }
  0x1c   :  { %1518 = vmatprep.subr.msk.bf16.mxu0 %vm401_vm0, %v1531_v23  ;;  %238 = vperm.xlu1 %1526, %v112_v25   ;;  %v1549_v23 = vld [vmem:[%s2075_s1 + $0x70] sm:$0xff]   ;;  %v1155_v25 = vld [vmem:[%s2078_s8] sm:$0xff] }
  0x1f   :  { %153 = vperm.xlu0 %1525, %v95_v26   ;;  %v1156_v26 = vld [vmem:[%s2078_s8 + $0x8] sm:$0xff] }
  0x20   :  { %158 = vperm.xlu1 %1526, %v96_v27   ;;  %v1550_v27 = vld [vmem:[%s2075_s1 + $0x78] sm:$0xff]  }
  0x23   :  { %1439 = vmatpush3.bf16.xpose.msra.mxu0 %v463_v28  ;;  %243 = vperm.xlu0 %1525, %v113_v30   ;;  %v1219_v28 = vld [vmem:[%s2079_s9] sm:$0xff] }
  0x24   :  { %1519 = vmatprep.subr.msk.bf16.mxu0 %vm401_vm0, %v1532_v29  ;;  %248 = vperm.xlu1 %1526, %v114_v31   ;;  %v1220_v29 = vld [vmem:[%s2079_s9 + $0x8] sm:$0xff]  ;;  %v1240_v30 = vld [vmem:[#allocation2] sm:$0x1] }
  0x27   :  { %163 = vperm.xlu0 %1525, %v97_v32  }
  0x28   :  { %168 = vperm.xlu1 %1526, %v98_v33  }
  0x2b   :  { %1441 = vmatpush3.bf16.xpose.msra.mxu0 %v466_v34  ;;  %253 = vperm.xlu0 %1525, %v115_v36  }
  0x2c   :  { %1520 = vmatprep.subr.msk.bf16.mxu0 %vm401_vm0, %v1533_v35  ;;  %258 = vperm.xlu1 %1526, %v116_v37   ;;  %v1553_v35 = vld [vmem:[%s2080_s3 + $0x4] ss:$8 sps:$4 sm:$0xff]  }
  0x2d   :  { %907 = vmatprep.mubr.bf16.mxu1 %v1553_v35 }
  0x2f   :  { %173 = vperm.xlu0 %1525, %v99_v38  }
  0x30   :  { %178 = vperm.xlu1 %1526, %v100_v39  }
  0x33   :  { %1443 = vmatpush3.bf16.xpose.msra.mxu0 %v469_v40  ;;  %263 = vperm.xlu0 %1525, %v117_v42  }
  0x34   :  { %1521 = vmatprep.subr.msk.bf16.mxu0 %vm401_vm0, %v1534_v41  ;;  %268 = vperm.xlu1 %1526, %v118_v43  }
  0x37   :  { %183 = vperm.xlu0 %1525, %v101_v44  }
  0x38   :  { %188 = vperm.xlu1 %1526, %v102_v45  }
  0x3b   :  { %1445 = vmatpush3.bf16.xpose.msra.mxu0 %v472_v46  ;;  %273 = vperm.xlu0 %1525, %v119_v47  }
  0x3c   :  { %278 = vperm.xlu1 %1526, %v120_v48  }
  0x3f   :  { %193 = vperm.xlu0 %1525, %v103_v50  }
  0x40   :  { %198 = vperm.xlu1 %1526, %v104_v52  }
  0x42   :  { %1447 = vmatmul.mubr.msk.bf16.vlgmr.msra.gmra.mrb[0].mxu0 %vm401_vm0, %v1536_v49 }
  0x43   :  { %1450 = vmatprep.mubr.msk.bf16.mxu0 %vm401_vm0, %v1537_v51  ;;  %717 = vperm.xlu0 %1525, %v699_v53  }
  0x44   :  { %722 = vperm.xlu1 %1526, %v700_v54  }
  0x47   :  { %727 = vperm.xlu0 %1525, %v701_v56  }
  0x48   :  { %732 = vperm.xlu1 %1526, %v702_v58  }
  0x4a   :  { %1451 = vmatmul.mubr.msk.bf16.gmra.mrb[4].mxu0 %vm401_vm0, %v1538_v55 }
  0x4b   :  { %1454 = vmatprep.mubr.msk.bf16.mxu0 %vm401_vm0, %v1539_v57  ;;  %737 = vperm.xlu0 %1525, %v703_v59  }
  0x4c   :  { %742 = vperm.xlu1 %1526, %v704_v60  }
  0x4f   :  { %747 = vperm.xlu0 %1525, %v705_v62  }
  0x50   :  { %752 = vperm.xlu1 %1526, %v706_v0  }
  0x52   :  { %1455 = vmatmul.mubr.msk.bf16.gmra.mrb[8].mxu0 %vm401_vm0, %v1540_v61 }
  0x53   :  { %1458 = vmatprep.mubr.msk.bf16.mxu0 %vm401_vm0, %v1541_v63  ;;  %757 = vperm.xlu0 %1525, %v707_v1  }
  0x54   :  { %762 = vperm.xlu1 %1526, %v708_v2  }
  0x57   :  { %767 = vperm.xlu0 %1525, %v709_v4  }
  0x58   :  { %772 = vperm.xlu1 %1526, %v710_v6  }
  0x5a   :  { %1459 = vmatmul.mubr.msk.bf16.gmra.mrb[12].mxu0 %vm401_vm0, %v1542_v3 }
  0x5b   :  { %1462 = vmatprep.mubr.msk.bf16.mxu0 %vm401_vm0, %v1543_v5  ;;  %777 = vperm.xlu0 %1525, %v711_v7  }
  0x5c   :  { %782 = vperm.xlu1 %1526, %v712_v8  }
  0x5f   :  { %787 = vperm.xlu0 %1525, %v713_v10  }
  0x60   :  { %792 = vperm.xlu1 %1526, %v714_v12  }
  0x62   :  { %1463 = vmatmul.mubr.msk.bf16.gmra.mrb[16].mxu0 %vm401_vm0, %v1544_v9 }
  0x63   :  { %1466 = vmatprep.mubr.msk.bf16.mxu0 %vm401_vm0, %v1545_v11  ;;  %1014 = vperm.xlu0 %1525, %v1004_v13  }
  0x64   :  { %1019 = vperm.xlu1 %1526, %v1005_v14  }
  0x67   :  { %1024 = vperm.xlu0 %1525, %v1006_v16  }
  0x68   :  { %1029 = vperm.xlu1 %1526, %v1007_v18  }
  0x6a   :  { %1467 = vmatmul.mubr.msk.bf16.gmra.mrb[20].mxu0 %vm401_vm0, %v1546_v15 }
  0x6b   :  { %1470 = vmatprep.mubr.msk.bf16.mxu0 %vm401_vm0, %v1547_v17  ;;  %1034 = vperm.xlu0 %1525, %v1008_v19  }
  0x6c   :  { %1039 = vperm.xlu1 %1526, %v1009_v20  }
  0x6f   :  { %1044 = vperm.xlu0 %1525, %v1010_v22  }
  0x70   :  { %1049 = vperm.xlu1 %1526, %v1011_v24  }
  0x72   :  { %1471 = vmatmul.mubr.msk.bf16.gmra.mrb[24].mxu0 %vm401_vm0, %v1548_v21 }
  0x73   :  { %1474 = vmatprep.mubr.msk.bf16.mxu0 %vm401_vm0, %v1549_v23  ;;  %1159 = vperm.xlu0 %1525, %v1155_v25  }
  0x74   :  { %1164 = vperm.xlu1 %1526, %v1156_v26  }
  0x77   :  { %1223 = vperm.xlu0 %1525, %v1219_v28  }
  0x78   :  { %1228 = vperm.xlu1 %1526, %v1220_v29  }
  0x7a   :  { %1475 = vmatmul.mubr.msk.bf16.gmra.mrb[28].mxu0 %vm401_vm0, %v1550_v27 }
  0x7b   :  { %1243 = vperm.xlu0 %1525, %v1240_v30  }
  0x82   :  { %v1934_v31 = vpop.permute.xlu0 %203 }
  0x83   :  { %v124_v32 = vpop.permute.xlu1 %123 }
  0x86   :  { %v1936_v33 = vpop.permute.xlu0 %208 }
  0x87   :  { %v129_v34 = vpop.permute.xlu1 %128 }
  0x8a   :  { %v1941_v36 = vpop.permute.xlu0 %213 }
  0x8b   :  { %v1943_v37 = vpop.permute.xlu1 %218 }
  0x8e   :  { %v134_v38 = vpop.permute.xlu0 %133 }
  0x8f   :  { %v139_v39 = vpop.permute.xlu1 %138 }
  0x92   :  { %v1945_v40 = vpop.permute.xlu0 %223 }
  0x93   :  { %v1947_v41 = vpop.permute.xlu1 %228 }
  0x96   :  { %v144_v42 = vpop.permute.xlu0 %143 }
  0x97   :  { %v149_v43 = vpop.permute.xlu1 %148 }
  0x9a   :  { %v1949_v44 = vpop.permute.xlu0 %233 }
  0x9b   :  { %v1951_v45 = vpop.permute.xlu1 %238 }
  0x9e   :  { %v154_v46 = vpop.permute.xlu0 %153 }
  0x9f   :  { %v159_v47 = vpop.permute.xlu1 %158 }
  0xa2   :  { %v1953_v48 = vpop.permute.xlu0 %243 }
  0xa3   :  { %v1955_v49 = vpop.permute.xlu1 %248 }
  0xa6   :  { %v164_v50 = vpop.permute.xlu0 %163 }
  0xa7   :  { %v169_v51 = vpop.permute.xlu1 %168 }
  0xaa   :  { %v1957_v52 = vpop.permute.xlu0 %253 }
  0xab   :  { %v1959_v53 = vpop.permute.xlu1 %258 }
  0xae   :  { %v174_v54 = vpop.permute.xlu0 %173 }
  0xaf   :  { %v179_v58 = vpop.permute.xlu1 %178 }
  0xb2   :  { %v1961_v2 = vpop.permute.xlu0 %263 }
  0xb3   :  { %v1965_v6 = vpop.permute.xlu1 %268 }
  0xb6   :  { %v184_v15 = vpop.permute.xlu0 %183 }
  0xb7   :  { %v189_v19 = vpop.permute.xlu1 %188 }
  0xba   :  { %v1973_v27 = vpop.permute.xlu0 %273 }
 0x115   :  { %v1448_v55 = vpop.f32.mrb[0].mxu0 }
 0x116   :  { %v517_v56 = vadd.f32 %v1448_v55, %v134_v38  ;;  %v508_v57 = vpop.f32.mrb[1].mxu0 }
 0x117   :  { %v509_v59 = vadd.f32 %v508_v57, %v124_v32  ;;  %v1449_v60 = vpop.f32.mrb[2].mxu0 }
 0x118   :  { %v520_v61 = vadd.f32 %v1449_v60, %v139_v39  ;;  %v511_v62 = vpop.f32.mrb[3].mxu0  ;;  %v637_v0 = vmax.f32 %v517_v56, 0.0 }
 0x119   :  { %v512_v63 = vadd.f32 %v511_v62, %v129_v34  ;;  %v635_v3 = vmax.f32 %v509_v59, 0.0  ;;  %v1975_v34 = vpop.permute.xlu1 %278 }
 0x11a   :  { %v638_v1 = vmax.f32 %v520_v61, 0.0 }
 0x11b   :  { %v636_v4 = vmax.f32 %v512_v63, 0.0 }
 0x11c   :  { %v1963_v5 = vpack.c.bf16 %v638_v1, %v637_v0 }
 0x11d   :  { %v1452_v7 = vpop.f32.mrb[4].mxu0  ;;  %v1967_v8 = vpack.c.bf16 %v636_v4, %v635_v3  ;;  %v199_v59 = vpop.permute.xlu1 %198 }
 0x11e   :  { %v533_v9 = vadd.f32 %v1452_v7, %v154_v46  ;;  %v524_v10 = vpop.f32.mrb[5].mxu0 }
 0x11f   :  { %v525_v11 = vadd.f32 %v524_v10, %v144_v42  ;;  %v1453_v12 = vpop.f32.mrb[6].mxu0 }
 0x120   :  { %v536_v13 = vadd.f32 %v1453_v12, %v159_v47  ;;  %v527_v14 = vpop.f32.mrb[7].mxu0  ;;  %v641_v17 = vmax.f32 %v533_v9, 0.0  ;;  %v194_v47 = vpop.permute.xlu0 %193 }
 0x121   :  { %v528_v16 = vadd.f32 %v527_v14, %v149_v43  ;;  %v639_v20 = vmax.f32 %v525_v11, 0.0 }
 0x122   :  { %v642_v18 = vmax.f32 %v536_v13, 0.0 }
 0x123   :  { %v640_v21 = vmax.f32 %v528_v16, 0.0 }
 0x124   :  { %v1969_v22 = vpack.c.bf16 %v642_v18, %v641_v17 }
 0x125   :  { %v1971_v23 = vpack.c.bf16 %v640_v21, %v639_v20  ;;  %v1456_v24 = vpop.f32.mrb[8].mxu0 }
 0x126   :  { %v549_v25 = vadd.f32 %v1456_v24, %v174_v54  ;;  %v540_v26 = vpop.f32.mrb[9].mxu0 }
 0x127   :  { %v541_v28 = vadd.f32 %v540_v26, %v164_v50  ;;  %v1457_v29 = vpop.f32.mrb[10].mxu0 }
 0x128   :  { %v552_v30 = vadd.f32 %v1457_v29, %v179_v58  ;;  %v543_v32 = vpop.f32.mrb[11].mxu0  ;;  %v645_v38 = vmax.f32 %v549_v25, 0.0 }
 0x129   :  { %v544_v35 = vadd.f32 %v543_v32, %v169_v51  ;;  %v643_v42 = vmax.f32 %v541_v28, 0.0 }
 0x12a   :  { %v646_v39 = vmax.f32 %v552_v30, 0.0 }
 0x12b   :  { %v644_v43 = vmax.f32 %v544_v35, 0.0 }
 0x12c   :  { %v1977_v46 = vpack.c.bf16 %v646_v39, %v645_v38 }
 0x12d   :  { %v1979_v55 = vpack.c.bf16 %v644_v43, %v643_v42  ;;  %v1460_v54 = vpop.f32.mrb[12].mxu0 }
 0x12e   :  { %v565_v56 = vadd.f32 %v1460_v54, %v194_v47  ;;  %v556_v57 = vpop.f32.mrb[13].mxu0 }
 0x12f   :  { %v557_v50 = vadd.f32 %v556_v57, %v184_v15  ;;  %v1461_v60 = vpop.f32.mrb[14].mxu0 }
 0x130   :  { %v568_v58 = vadd.f32 %v1461_v60, %v199_v59  ;;  %v559_v61 = vpop.f32.mrb[15].mxu0  ;;  %v649_v63 = vmax.f32 %v565_v56, 0.0 }
 0x131   :  { %v560_v62 = vadd.f32 %v559_v61, %v189_v19  ;;  %v647_v0 = vmax.f32 %v557_v50, 0.0 }
 0x132   :  { %v650_v51 = vmax.f32 %v568_v58, 0.0 }
 0x133   :  { %v648_v1 = vmax.f32 %v560_v62, 0.0 }
 0x134   :  { %v1981_v3 = vpack.c.bf16 %v650_v51, %v649_v63 }
 0x135   :  { %v1983_v4 = vpack.c.bf16 %v648_v1, %v647_v0  ;;  %v1464_v7 = vpop.f32.mrb[16].mxu0  ;;  %v1560_v1 = vld [vmem:[%s2080_s3 + $0x34] ss:$8 sps:$4 sm:$0xff]  }
 0x136   :  { %v581_v9 = vadd.f32 %v1464_v7, %v1941_v36  ;;  %v572_v10 = vpop.f32.mrb[17].mxu0  ;;  %v1565_v7 = vld [vmem:[%s2080_s3 + $0x40] ss:$8 sps:$4 sm:$0xff]  }
 0x137   :  { %v573_v11 = vadd.f32 %v572_v10, %v1934_v31  ;;  %v1465_v12 = vpop.f32.mrb[18].mxu0  ;;  %v1568_v10 = vld [vmem:[%s2080_s3 + $0x50] ss:$8 sps:$4 sm:$0xff]  }
 0x138   :  { %v584_v13 = vadd.f32 %v1465_v12, %v1943_v37  ;;  %v575_v14 = vpop.f32.mrb[19].mxu0  ;;  %v653_v16 = vmax.f32 %v581_v9, 0.0  ;;  %v1566_v9 = vld [vmem:[%s2080_s3 + $0x54] ss:$8 sps:$4 sm:$0xff]   ;;  %v1571_v12 = vld [vmem:[%s2080_s3 + $0x60] ss:$8 sps:$4 sm:$0xff]  }
 0x139   :  { %v576_v15 = vadd.f32 %v575_v14, %v1936_v33  ;;  %v651_v18 = vmax.f32 %v573_v11, 0.0  ;;  %v1569_v11 = vld [vmem:[%s2080_s3 + $0x64] ss:$8 sps:$4 sm:$0xff]   ;;  %v1574_v14 = vld [vmem:[%s2080_s3 + $0x70] ss:$8 sps:$4 sm:$0xff]  }
 0x13a   :  { %v654_v17 = vmax.f32 %v584_v13, 0.0  ;;  %v1572_v13 = vld [vmem:[%s2080_s3 + $0x74] ss:$8 sps:$4 sm:$0xff]  }
 0x13b   :  { %v652_v19 = vmax.f32 %v576_v15, 0.0  ;;  %v1575_v15 = vld [vmem:[%s2081_s5] sm:$0xff]  }
 0x13c   :  { %v676_v20 = vpack.c.bf16 %v654_v17, %v653_v16 }
 0x13d   :  { %v1468_v21 = vpop.f32.mrb[20].mxu0  ;;  %v675_v24 = vpack.c.bf16 %v652_v19, %v651_v18 }
 0x13e   :  { %v597_v25 = vadd.f32 %v1468_v21, %v1949_v44  ;;  %v588_v26 = vpop.f32.mrb[21].mxu0 }
 0x13f   :  { %v589_v36 = vadd.f32 %v588_v26, %v1945_v40  ;;  %v1469_v28 = vpop.f32.mrb[22].mxu0  ;;  %1349 = vmatprep.subr.bf16.mxu1 %v675_v24  ;;  %v723_v26 = vpop.permute.xlu1 %722 }
 0x140   :  { %v600_v31 = vadd.f32 %v1469_v28, %v1951_v45  ;;  %v591_v37 = vpop.f32.mrb[23].mxu0  ;;  %1350 = vmatpush3.bf16.msra.mxu1 %v1967_v8  ;;  %v657_v29 = vmax.f32 %v597_v25, 0.0 }
 0x141   :  { %v592_v33 = vadd.f32 %v591_v37, %v1947_v41  ;;  %1351 = vmatprep.subr.bf16.mxu1 %v676_v20  ;;  %v655_v32 = vmax.f32 %v589_v36, 0.0  ;;  %v718_v20 = vpop.permute.xlu0 %717 }
 0x142   :  { %v658_v30 = vmax.f32 %v600_v31, 0.0 }
 0x143   :  { %v656_v35 = vmax.f32 %v592_v33, 0.0 }
 0x144   :  { %v678_v38 = vpack.c.bf16 %v658_v30, %v657_v29  ;;  %1352 = vmatpush3.bf16.msra.mxu1 %v1963_v5 }
 0x145   :  { %v677_v44 = vpack.c.bf16 %v656_v35, %v655_v32  ;;  %v1472_v39 = vpop.f32.mrb[24].mxu0  ;;  %v728_v35 = vpop.permute.xlu0 %727 }
 0x146   :  { %v613_v40 = vadd.f32 %v1472_v39, %v1957_v52  ;;  %v604_v42 = vpop.f32.mrb[25].mxu0 }
 0x147   :  { %v605_v45 = vadd.f32 %v604_v42, %v1953_v48  ;;  %v1473_v43 = vpop.f32.mrb[26].mxu0  ;;  %1353 = vmatprep.subr.bf16.mxu1 %v677_v44 }
 0x148   :  { %v616_v8 = vadd.f32 %v1473_v43, %v1959_v53  ;;  %v607_v41 = vpop.f32.mrb[27].mxu0  ;;  %1354 = vmatpush3.bf16.msra.mxu1 %v1971_v23  ;;  %v661_v54 = vmax.f32 %v613_v40, 0.0  ;;  %v733_v40 = vpop.permute.xlu1 %732 }
 0x149   :  { %v608_v47 = vadd.f32 %v607_v41, %v1955_v49  ;;  %1355 = vmatprep.subr.bf16.mxu1 %v678_v38  ;;  %v659_v5 = vmax.f32 %v605_v45, 0.0 }
 0x14a   :  { %v662_v56 = vmax.f32 %v616_v8, 0.0 }
 0x14b   :  { %v660_v57 = vmax.f32 %v608_v47, 0.0 }
 0x14c   :  { %v680_v59 = vpack.c.bf16 %v662_v56, %v661_v54  ;;  %1356 = vmatpush3.bf16.msra.mxu1 %v1969_v22 }
 0x14d   :  { %v679_v52 = vpack.c.bf16 %v660_v57, %v659_v5  ;;  %v1476_v50 = vpop.f32.mrb[28].mxu0  ;;  %v738_v5 = vpop.permute.xlu0 %737 }
 0x14e   :  { %v629_v48 = vadd.f32 %v1476_v50, %v1973_v27  ;;  %v620_v60 = vpop.f32.mrb[29].mxu0  ;;  %v743_v50 = vpop.permute.xlu1 %742 }
 0x14f   :  { %v621_v53 = vadd.f32 %v620_v60, %v1961_v2  ;;  %v1477_v58 = vpop.f32.mrb[30].mxu0  ;;  %1357 = vmatprep.subr.bf16.mxu1 %v679_v52  ;;  %v1551_v2 = vld [vmem:[%s2080_s3] ss:$8 sps:$4 sm:$0xff]  }
 0x150   :  { %v632_v23 = vadd.f32 %v1477_v58, %v1975_v34  ;;  %v623_v49 = vpop.f32.mrb[31].mxu0  ;;  %1358 = vmatpush3.bf16.msra.mxu1 %v1979_v55  ;;  %v665_v62 = vmax.f32 %v629_v48, 0.0  ;;  %v1556_v34 = vld [vmem:[%s2080_s3 + $0x10] ss:$8 sps:$4 sm:$0xff]   ;;  %v1559_v55 = vld [vmem:[%s2080_s3 + $0x20] ss:$8 sps:$4 sm:$0xff]  }
 0x151   :  { %v624_v61 = vadd.f32 %v623_v49, %v1965_v6  ;;  %1359 = vmatprep.subr.bf16.mxu1 %v680_v59  ;;  %v663_v22 = vmax.f32 %v621_v53, 0.0  ;;  %v1554_v6 = vld [vmem:[%s2080_s3 + $0x14] ss:$8 sps:$4 sm:$0xff]  }
 0x152   :  { %v666_v63 = vmax.f32 %v632_v23, 0.0 }
 0x153   :  { %v664_v51 = vmax.f32 %v624_v61, 0.0 }
 0x154   :  { %v682_v0 = vpack.c.bf16 %v666_v63, %v665_v62  ;;  %1360 = vmatpush3.bf16.msra.mxu1 %v1977_v46  ;;  %v1557_v46 = vld [vmem:[%s2080_s3 + $0x24] ss:$8 sps:$4 sm:$0xff]   ;;  %v748_v63 = vpop.permute.xlu0 %747 }
 0x155   :  { %v681_v27 = vpack.c.bf16 %v664_v51, %v663_v22 }
 0x157   :  { %1361 = vmatprep.subr.bf16.mxu1 %v681_v27  ;;  %v753_v27 = vpop.permute.xlu1 %752 }
 0x158   :  { %1362 = vmatpush3.bf16.msra.mxu1 %v1983_v4  ;;  %v1563_v4 = vld [vmem:[%s2080_s3 + $0x44] ss:$8 sps:$4 sm:$0xff]  }
 0x159   :  { %1363 = vmatprep.subr.bf16.mxu1 %v682_v0 }
 0x15c   :  { %1364 = vmatpush3.bf16.msra.mxu1 %v1981_v3  ;;  %v1562_v3 = vld [vmem:[%s2080_s3 + $0x30] ss:$8 sps:$4 sm:$0xff]  }
 0x15f   :  { %908 = vmatmul.mubr.bf16.vlgmr.msra.gmra.mrb[0].mxu1 %v1551_v2 }
 0x160   :  { %915 = vmatprep.mubr.bf16.mxu1 %v1554_v6 }
 0x167   :  { %916 = vmatmul.mubr.bf16.gmra.mrb[4].mxu1 %v1556_v34 }
 0x168   :  { %923 = vmatprep.mubr.bf16.mxu1 %v1557_v46 }
 0x16f   :  { %924 = vmatmul.mubr.bf16.gmra.mrb[8].mxu1 %v1559_v55 }
 0x170   :  { %931 = vmatprep.mubr.bf16.mxu1 %v1560_v1 }
 0x177   :  { %932 = vmatmul.mubr.bf16.gmra.mrb[12].mxu1 %v1562_v3 }
 0x178   :  { %939 = vmatprep.mubr.bf16.mxu1 %v1563_v4 }
 0x17f   :  { %940 = vmatmul.mubr.bf16.gmra.mrb[16].mxu1 %v1565_v7  ;;  %v758_v7 = vpop.permute.xlu0 %757 }
 0x180   :  { %947 = vmatprep.mubr.bf16.mxu1 %v1566_v9 }
 0x187   :  { %948 = vmatmul.mubr.bf16.gmra.mrb[20].mxu1 %v1568_v10 }
 0x188   :  { %955 = vmatprep.mubr.bf16.mxu1 %v1569_v11 }
 0x18f   :  { %956 = vmatmul.mubr.bf16.gmra.mrb[24].mxu1 %v1571_v12  ;;  %v763_v12 = vpop.permute.xlu1 %762 }
 0x190   :  { %963 = vmatprep.mubr.bf16.mxu1 %v1572_v13 }
 0x197   :  { %964 = vmatmul.mubr.bf16.gmra.mrb[28].mxu1 %v1574_v14 }
 0x198   :  { %1494 = vmatprep.mubr.bf16.mxu1 %v1575_v15 }
 0x232   :  { %v1365_v16 = vpop.f32.mrb[0].mxu1 }
 0x233   :  { %v1366_v17 = vpop.f32.mrb[1].mxu1 }
 0x234   :  { %v1367_v18 = vadd.f32 %v1366_v17, %v1365_v16  ;;  %v1368_v19 = vpop.f32.mrb[2].mxu1 }
 0x235   :  { %v1369_v21 = vpop.f32.mrb[3].mxu1 }
 0x236   :  { %v910_v24 = vadd.f32 %v1367_v18, %v718_v20  ;;  %v1370_v25 = vadd.f32 %v1369_v21, %v1368_v19  ;;  %v768_v21 = vpop.permute.xlu0 %767 }
 0x238   :  { %v913_v36 = vadd.f32 %v1370_v25, %v723_v26  ;;  %v972_v28 = vmax.f32 %v910_v24, 0.0 }
 0x23a   :  { %v973_v31 = vmax.f32 %v913_v36, 0.0  ;;  %v1371_v37 = vpop.f32.mrb[4].mxu1  ;;  %v773_v36 = vpop.permute.xlu1 %772 }
 0x23b   :  { %v1372_v33 = vpop.f32.mrb[5].mxu1 }
 0x23c   :  { %v1373_v29 = vadd.f32 %v1372_v33, %v1371_v37  ;;  %v1374_v30 = vpop.f32.mrb[6].mxu1  ;;  %v988_v32 = vpack.c.bf16 %v973_v31, %v972_v28 }
 0x23d   :  { %v1375_v38 = vpop.f32.mrb[7].mxu1 }
 0x23e   :  { %v918_v44 = vadd.f32 %v1373_v29, %v728_v35  ;;  %v1376_v39 = vadd.f32 %v1375_v38, %v1374_v30  ;;  %1478 = vmatprep.subr.bf16.mxu1 %v988_v32  ;;  %v778_v38 = vpop.permute.xlu0 %777 }
 0x23f   :  { %1479 = vmatpush3.bf16.msra.mxu1 %v988_v32 }
 0x240   :  { %v921_v42 = vadd.f32 %v1376_v39, %v733_v40  ;;  %v974_v45 = vmax.f32 %v918_v44, 0.0 }
 0x242   :  { %v975_v43 = vmax.f32 %v921_v42, 0.0  ;;  %v1377_v8 = vpop.f32.mrb[8].mxu1  ;;  %v783_v42 = vpop.permute.xlu1 %782 }
 0x243   :  { %v1378_v41 = vpop.f32.mrb[9].mxu1 }
 0x244   :  { %v1379_v47 = vadd.f32 %v1378_v41, %v1377_v8  ;;  %v1380_v54 = vpop.f32.mrb[10].mxu1  ;;  %v989_v56 = vpack.c.bf16 %v975_v43, %v974_v45 }
 0x245   :  { %v1381_v57 = vpop.f32.mrb[11].mxu1 }
 0x246   :  { %v926_v59 = vadd.f32 %v1379_v47, %v738_v5  ;;  %v1382_v52 = vadd.f32 %v1381_v57, %v1380_v54  ;;  %1480 = vmatprep.subr.bf16.mxu1 %v989_v56  ;;  %v788_v57 = vpop.permute.xlu0 %787 }
 0x247   :  { %1481 = vmatpush3.bf16.msra.mxu1 %v989_v56 }
 0x248   :  { %v929_v48 = vadd.f32 %v1382_v52, %v743_v50  ;;  %v976_v60 = vmax.f32 %v926_v59, 0.0 }
 0x24a   :  { %v977_v53 = vmax.f32 %v929_v48, 0.0  ;;  %v1383_v58 = vpop.f32.mrb[12].mxu1  ;;  %v793_v48 = vpop.permute.xlu1 %792 }
 0x24b   :  { %v1384_v23 = vpop.f32.mrb[13].mxu1 }
 0x24c   :  { %v1385_v49 = vadd.f32 %v1384_v23, %v1383_v58  ;;  %v1386_v61 = vpop.f32.mrb[14].mxu1  ;;  %v990_v62 = vpack.c.bf16 %v977_v53, %v976_v60 }
 0x24d   :  { %v1387_v22 = vpop.f32.mrb[15].mxu1 }
 0x24e   :  { %v934_v51 = vadd.f32 %v1385_v49, %v748_v63  ;;  %v1388_v0 = vadd.f32 %v1387_v22, %v1386_v61  ;;  %1482 = vmatprep.subr.bf16.mxu1 %v990_v62  ;;  %v1576_v49 = vld [vmem:[%s2081_s5 + $0x8] sm:$0xff]   ;;  %v1577_v61 = vld [vmem:[%s2081_s5 + $0x10] sm:$0xff]   ;;  %v1585_v63 = vmov 0.0   ;;  %v1015_v22 = vpop.permute.xlu0 %1014 }
 0x24f   :  { %1483 = vmatpush3.bf16.msra.mxu1 %v990_v62  ;;  %v1578_v62 = vld [vmem:[%s2081_s5 + $0x18] sm:$0xff]  }
 0x250   :  { %v937_v2 = vadd.f32 %v1388_v0, %v753_v27  ;;  %v978_v6 = vmax.f32 %v934_v51, 0.0  ;;  %v1020_v51 = vpop.permute.xlu1 %1019 }
 0x252   :  { %v979_v34 = vmax.f32 %v937_v2, 0.0  ;;  %v1389_v46 = vpop.f32.mrb[16].mxu1  ;;  %v1025_v0 = vpop.permute.xlu0 %1024 }
 0x253   :  { %v1390_v55 = vpop.f32.mrb[17].mxu1 }
 0x254   :  { %v1391_v1 = vadd.f32 %v1390_v55, %v1389_v46  ;;  %v1392_v3 = vpop.f32.mrb[18].mxu1  ;;  %v991_v4 = vpack.c.bf16 %v979_v34, %v978_v6  ;;  %v1030_v27 = vpop.permute.xlu1 %1029 }
 0x255   :  { %v1393_v9 = vpop.f32.mrb[19].mxu1 }
 0x256   :  { %v942_v10 = vadd.f32 %v1391_v1, %v758_v7  ;;  %v1394_v11 = vadd.f32 %v1393_v9, %v1392_v3  ;;  %1484 = vmatprep.subr.bf16.mxu1 %v991_v4  ;;  %v1035_v46 = vpop.permute.xlu0 %1034 }
 0x257   :  { %1485 = vmatpush3.bf16.msra.mxu1 %v991_v4 }
 0x258   :  { %v945_v13 = vadd.f32 %v1394_v11, %v763_v12  ;;  %v980_v14 = vmax.f32 %v942_v10, 0.0  ;;  %v1040_v7 = vpop.permute.xlu1 %1039 }
 0x25a   :  { %v981_v15 = vmax.f32 %v945_v13, 0.0  ;;  %v1395_v16 = vpop.f32.mrb[20].mxu1 }
 0x25b   :  { %v1396_v17 = vpop.f32.mrb[21].mxu1 }
 0x25c   :  { %v1397_v18 = vadd.f32 %v1396_v17, %v1395_v16  ;;  %v1398_v19 = vpop.f32.mrb[22].mxu1  ;;  %v992_v20 = vpack.c.bf16 %v981_v15, %v980_v14  ;;  %v1045_v15 = vpop.permute.xlu0 %1044 }
 0x25d   :  { %v1399_v24 = vpop.f32.mrb[23].mxu1 }
 0x25e   :  { %v950_v25 = vadd.f32 %v1397_v18, %v768_v21  ;;  %v1400_v26 = vadd.f32 %v1399_v24, %v1398_v19  ;;  %1486 = vmatprep.subr.bf16.mxu1 %v992_v20 }
 0x25f   :  { %1487 = vmatpush3.bf16.msra.mxu1 %v992_v20  ;;  %v1050_v20 = vpop.permute.xlu1 %1049 }
 0x260   :  { %v953_v28 = vadd.f32 %v1400_v26, %v773_v36  ;;  %v982_v31 = vmax.f32 %v950_v25, 0.0 }
 0x262   :  { %v983_v37 = vmax.f32 %v953_v28, 0.0  ;;  %v1401_v33 = vpop.f32.mrb[24].mxu1 }
 0x263   :  { %v1402_v29 = vpop.f32.mrb[25].mxu1 }
 0x264   :  { %v1403_v30 = vadd.f32 %v1402_v29, %v1401_v33  ;;  %v1404_v32 = vpop.f32.mrb[26].mxu1  ;;  %v993_v35 = vpack.c.bf16 %v983_v37, %v982_v31 }
 0x265   :  { %v1405_v44 = vpop.f32.mrb[27].mxu1 }
 0x266   :  { %v958_v39 = vadd.f32 %v1403_v30, %v778_v38  ;;  %v1406_v40 = vadd.f32 %v1405_v44, %v1404_v32  ;;  %1488 = vmatprep.subr.bf16.mxu1 %v993_v35  ;;  %v1579_v32 = vld [vmem:[%s2082_s7] sm:$0xff]   ;;  %v1165_v38 = vpop.permute.xlu1 %1164 }
 0x267   :  { %1489 = vmatpush3.bf16.msra.mxu1 %v993_v35  ;;  %v1160_v35 = vpop.permute.xlu0 %1159 }
 0x268   :  { %v961_v45 = vadd.f32 %v1406_v40, %v783_v42  ;;  %v984_v43 = vmax.f32 %v958_v39, 0.0 }
 0x26a   :  { %v985_v8 = vmax.f32 %v961_v45, 0.0  ;;  %v1407_v41 = vpop.f32.mrb[28].mxu1 }
 0x26b   :  { %v1408_v47 = vpop.f32.mrb[29].mxu1 }
 0x26c   :  { %v1409_v54 = vadd.f32 %v1408_v47, %v1407_v41  ;;  %v1410_v56 = vpop.f32.mrb[30].mxu1  ;;  %v994_v5 = vpack.c.bf16 %v985_v8, %v984_v43  ;;  %v1224_v47 = vpop.permute.xlu0 %1223 }
 0x26d   :  { %v1411_v59 = vpop.f32.mrb[31].mxu1 }
 0x26e   :  { %v966_v52 = vadd.f32 %v1409_v54, %v788_v57  ;;  %v1412_v50 = vadd.f32 %v1411_v59, %v1410_v56  ;;  %1490 = vmatprep.subr.bf16.mxu1 %v994_v5  ;;  %v1229_v54 = vpop.permute.xlu1 %1228  ;;  %v1246_v57 = vlaneseq }
 0x26f   :  { %1491 = vmatpush3.bf16.msra.mxu1 %v994_v5 }
 0x270   :  { %v969_v60 = vadd.f32 %v1412_v50, %v793_v48  ;;  %v986_v53 = vmax.f32 %v966_v52, 0.0  ;;  %v1247_v50 = vshrl.u32 %v1246_v57, 7 }
 0x272   :  { %v987_v58 = vmax.f32 %v969_v60, 0.0 }
 0x274   :  { %v995_v23 = vpack.c.bf16 %v987_v58, %v986_v53  ;;  %v1248_v53 = vsub.s32 0, %v1247_v50 }
 0x276   :  { %1492 = vmatprep.subr.bf16.mxu1 %v995_v23 }
 0x277   :  { %1493 = vmatpush3.bf16.msra.mxu1 %v995_v23  ;;  %v1244_v23 = vpop.permute.xlu0 %1243 }
 0x278   :  { %1502 = vmatprep.subr.bf16.mxu1 %v1585_v63 }
 0x27a   :  { %1495 = vmatmul.mubr.bf16.vlgmr.msra.gmra.mrb[32].mxu1 %v1576_v49 }
 0x27b   :  { %1498 = vmatprep.mubr.bf16.mxu1 %v1577_v61  ;;  %v1249_v61 = vrot.slane %v1244_v23, %v1248_v53 }
 0x282   :  { %1499 = vmatmul.mubr.bf16.gmra.mrb[36].mxu1 %v1578_v62 }
 0x283   :  { %1510 = vmatprep.mubr.msk.bf16.mxu1 %vm1586_vm1, %v1585_v63 }
 0x34d   :  { %v1496_v2 = vpop.f32.mrb[32].mxu1 }
 0x34e   :  { %v1119_v6 = vadd.f32 %v1496_v2, %v1025_v0  ;;  %v1110_v34 = vpop.f32.mrb[33].mxu1 }
 0x34f   :  { %v1111_v55 = vadd.f32 %v1110_v34, %v1015_v22  ;;  %v1497_v1 = vpop.f32.mrb[34].mxu1 }
 0x350   :  { %v1122_v3 = vadd.f32 %v1497_v1, %v1030_v27  ;;  %v1113_v4 = vpop.f32.mrb[35].mxu1  ;;  %v1143_v10 = vmax.f32 %v1119_v6, 0.0 }
 0x351   :  { %v1114_v9 = vadd.f32 %v1113_v4, %v1020_v51  ;;  %v1141_v12 = vmax.f32 %v1111_v55, 0.0 }
 0x352   :  { %v1144_v11 = vmax.f32 %v1122_v3, 0.0 }
 0x353   :  { %v1142_v13 = vmax.f32 %v1114_v9, 0.0 }
 0x354   :  { %v1150_v14 = vpack.c.bf16 %v1144_v11, %v1143_v10 }
 0x355   :  { %v1149_v16 = vpack.c.bf16 %v1142_v13, %v1141_v12  ;;  %v1500_v17 = vpop.f32.mrb[36].mxu1 }
 0x356   :  { %v1135_v18 = vadd.f32 %v1500_v17, %v1045_v15  ;;  %v1126_v19 = vpop.f32.mrb[37].mxu1 }
 0x357   :  { %v1127_v21 = vadd.f32 %v1126_v19, %v1035_v46  ;;  %v1501_v24 = vpop.f32.mrb[38].mxu1  ;;  %1503 = vmatpush3.bf16.msra.mxu1 %v1149_v16 }
 0x358   :  { %v1138_v25 = vadd.f32 %v1501_v24, %v1050_v20  ;;  %v1129_v26 = vpop.f32.mrb[39].mxu1  ;;  %1504 = vmatprep.subr.bf16.mxu1 %v1585_v63  ;;  %v1147_v28 = vmax.f32 %v1135_v18, 0.0 }
 0x359   :  { %v1130_v36 = vadd.f32 %v1129_v26, %v1040_v7  ;;  %v1145_v37 = vmax.f32 %v1127_v21, 0.0 }
 0x35a   :  { %v1148_v31 = vmax.f32 %v1138_v25, 0.0 }
 0x35b   :  { %v1146_v33 = vmax.f32 %v1130_v36, 0.0  ;;  %1505 = vmatpush3.bf16.msra.mxu1 %v1150_v14 }
 0x35c   :  { %v1152_v29 = vpack.c.bf16 %v1148_v31, %v1147_v28  ;;  %1506 = vmatprep.subr.bf16.mxu1 %v1585_v63 }
 0x35d   :  { %v1151_v30 = vpack.c.bf16 %v1146_v33, %v1145_v37 }
 0x35f   :  { %1507 = vmatpush3.bf16.msra.mxu1 %v1151_v30 }
 0x360   :  { %1508 = vmatprep.subr.bf16.mxu1 %v1585_v63 }
 0x363   :  { %1509 = vmatpush3.bf16.msra.mxu1 %v1152_v29 }
 0x366   :  { %1511 = vmatmul.mubr.msk.bf16.vlgmr.msra.gmra.mrb[40].mxu1 %vm1172_vm2, %v1579_v32 }
 0x439   :  { %v1210_v44 = vpop.f32.mrb[40].mxu1 }
 0x43a   :  { %v1211_v39 = vadd.f32 %v1210_v44, %v1160_v35  ;;  %v1512_v40 = vpop.f32.mrb[41].mxu1 }
 0x43b   :  { %v1213_v42 = vpop.f32.mrb[42].mxu1 }
 0x43c   :  { %v1217_v45 = vmax.f32 %v1211_v39, 0.0  ;;  %v1214_v43 = vadd.f32 %v1213_v42, %v1165_v38  ;;  %v1513_v8 = vpop.f32.mrb[43].mxu1 }
 0x43e   :  { %v1218_v41 = vmax.f32 %v1214_v43, 0.0  ;;  %v1231_v56 = vmul.f32 %v1224_v47, %v1217_v45 }
 0x440   :  { %v1232_v5 = vmul.f32 %v1229_v54, %v1218_v41 }
 0x442   :  { %v1233_v59 = vadd.f32 %v1232_v5, %v1231_v56 }
 0x444   :  { %v1234_v52 = vrot.slane %v1233_v59, 4 }
 0x446   :  { %v1235_v48 = vadd.f32 %v1234_v52, %v1233_v59 }
 0x448   :  { %v1236_v60 = vrot.slane %v1235_v48, 2 }
 0x44a   :  { %v1237_v58 = vadd.f32 %v1236_v60, %v1235_v48 }
 0x44c   :  { %v1238_v49 = vrot.slane %v1237_v58, 1 }
 0x44e   :  { %v1239_v62 = vadd.f32 %v1238_v49, %v1237_v58 }
 0x450   :  { %v1250_v63 = vadd.f32 %v1249_v61, %v1239_v62 }
 0x452   :  { %v1324_v22 = vmul.f32 -1.442695, %v1250_v63 }
 0x454   :  { %1580 = vpow2.f32 %v1324_v22 }
 0x45e   :  { %v1581_v51 = vpop.eup %1580 }
 0x45f   :  { %v1254_v0 = vadd.f32 1.0, %v1581_v51 }
 0x461   :  { %1582 = vrcp.f32 %v1254_v0 }
 0x46b   :  { %v1583_v27 = vpop.eup %1582 }
 0x46c   :  { %1257 = vst [vmem:[%s2083_s11] sm:$0x1] %v1583_v27 }

</bundles_post_ra>
